<compile_context>
chip_gen: v7x
topology: tpu7x:2x2x1
jax: 0.10.0
libtpu: 0.0.40
codegen_flags: <defaults>
</compile_context>

<pallas_src>
import functools

import jax
import jax.numpy as jnp
from jax import lax
from jax.experimental import pallas as pl
from jax.experimental.pallas import tpu as pltpu


def _round_up(x, m):
    return ((x + m - 1) // m) * m


def _cdiv(a, b):
    return (a + b - 1) // b


def _vmem_capacity_bytes():
    """Per-core VMEM capacity; conservative fallback if the query is unavailable."""
    try:
        info = pltpu.get_tpu_info()
        cap = int(getattr(info, "vmem_capacity_bytes", 0) or 0)
        if cap > 0:
            return cap
    except Exception:
        pass
    return 64 * 1024 * 1024  # v7x-sized fallback: safe on every generation


def _edge_dot_kernel(eu_ref, ev_ref, dw_ref, o_ref):
    # eu_ref/ev_ref : (H, TE)  raw gathered node embeddings, edges on lanes
    # dw_ref        : (H, 1)   diag weights with the learned scale folded in (f32)
    # o_ref         : (1, TE)  lane-dense per-edge output
    eu = eu_ref[...].astype(jnp.float32)                # upcast in-kernel (bf16 ok)
    ev = ev_ref[...].astype(jnp.float32)
    dw = dw_ref[...]                                    # (H, 1) -> lane broadcast

    s = jnp.sum(eu * dw * ev, axis=0, keepdims=True)    # (1, TE) weighted dot
    ssu = jnp.sum(eu * eu, axis=0, keepdims=True)       # (1, TE) squared norms
    ssv = jnp.sum(ev * ev, axis=0, keepdims=True)

    eps2 = jnp.float32(1e-24)                           # (torch eps=1e-12)^2
    z = s * lax.rsqrt(jnp.maximum(ssu, eps2) * jnp.maximum(ssv, eps2))
    o_ref[...] = z.astype(o_ref.dtype)


@functools.partial(jax.jit, static_argnames=("edge_tile",))
def local_emb_D_forward(emb, src, dst, d, scale, *, edge_tile=None):
    """emb: [N, H]; src/dst: [E] int edge endpoints; d: [H]; scale: [1]."""
    N, H = emb.shape
    E = src.shape[0]
    if E == 0:
        return jnp.zeros((0, 1), jnp.float32)

    itemsize = jnp.dtype(emb.dtype).itemsize

    # ---- Edge-tile sizing: derived from the per-core VMEM budget. -------------
    vmem_cap = _vmem_capacity_bytes()
    in_budget = max(8 << 20, min(vmem_cap // 4, 48 << 20))     # 2 streams x 2 bufs
    tile_max = max(128, (in_budget // (4 * H * itemsize)) // 128 * 128)

    if edge_tile is not None:
        tile = max(128, _round_up(int(edge_tile), 128))
    elif E <= 1024:
        tile = _round_up(E, 128)                 # tiny edge set: one small tile
    else:
        # >= 2 tiles so both v7x TensorCores get work on the "parallel" axis.
        tile = min(tile_max, _round_up(_cdiv(E, 2), 128))
    tile = min(tile, _round_up(E, 128))
    n_tiles = _cdiv(E, tile)
    E_pad = n_tiles * tile

    # ---- XLA-side prep (one gather pass, no (E, H) transpose materialized). ---
    # Pad only the tiny index vectors; padded edges point at node 0 and are
    # sliced off the output (the eps clamp keeps them finite even if row 0 is 0).
    src_pad = jnp.zeros((E_pad,), jnp.int32).at[:E].set(src.astype(jnp.int32))
    dst_pad = jnp.zeros((E_pad,), jnp.int32).at[:E].set(dst.astype(jnp.int32))

    # Transpose the small (N, H) table once, then gather columns so the big
    # (H, E_pad) operands come out directly in the edges-on-lanes layout, in the
    # embedding's native dtype (upcast happens inside the kernel).
    # TODO(synk): a fully in-kernel gather (VMEM-resident emb table + scalar-
    # prefetched indices / DMA gather) would remove this remaining XLA gather pass.
    emb_t = jnp.asarray(emb).T                           # (H, N), tiny transpose
    eu_t = jnp.take(emb_t, src_pad, axis=1)              # (H, E_pad)
    ev_t = jnp.take(emb_t, dst_pad, axis=1)              # (H, E_pad)

    # Fold the learned scale into the diagonal weights (always f32).
    dw = (d.astype(jnp.float32) * scale.astype(jnp.float32)).reshape(H, 1)

    # ---- VMEM accounting: always pass an explicit limit (v5e default = 16 MiB).
    needed = (2 * 2 * H * tile * itemsize        # 2 input streams x 2 pipeline bufs
              + 2 * tile * 4                     # (1, tile) f32 output double buffer
              + 2 * H * 4                        # dw
              + (2 << 20))                       # headroom for internal scratch
    cap_bytes = min(max(24 << 20, (vmem_cap * 3) // 4), 100 << 20)   # 48 MiB on v7x
    vmem_limit = int(min(max(needed * 5 // 4, 24 << 20), cap_bytes))
    if vmem_limit < needed + (1 << 20):
        vmem_limit = int(needed + (1 << 20))

    out = pl.pallas_call(
        _edge_dot_kernel,
        out_shape=jax.ShapeDtypeStruct((1, E_pad), jnp.float32),
        grid=(n_tiles,),
        in_specs=[
            pl.BlockSpec((H, tile), lambda i: (0, i)),   # eu tile
            pl.BlockSpec((H, tile), lambda i: (0, i)),   # ev tile
            pl.BlockSpec((H, 1), lambda i: (0, 0)),      # d * scale
        ],
        out_specs=pl.BlockSpec((1, tile), lambda i: (0, i)),
        compiler_params=pltpu.CompilerParams(
            dimension_semantics=("parallel",),
            vmem_limit_bytes=vmem_limit),
    )(eu_t, ev_t, dw)

    return out[0, :E].reshape(E, 1)


def _reference(emb, src, dst, d, scale):
    eps = 1e-12
    e32 = emb.astype(jnp.float32)
    n = jnp.maximum(jnp.linalg.norm(e32, axis=1, keepdims=True), eps)
    e = e32 / n
    ew = e * d[None, :].astype(jnp.float32)
    z = jnp.sum(ew[src] * e[dst], axis=-1, keepdims=True)
    return z * scale.astype(jnp.float32)


if __name__ == "__main__":
    key = jax.random.PRNGKey(0)

    # Module hyperparameter (n_hidden) and deterministic parameter init
    # matching the PyTorch module's __init__.
    H = 32
    d = jnp.ones((H,), dtype=jnp.float32)                # torch.ones(n_hidden)
    scale = jnp.full((1,), 0.5, dtype=jnp.float32)       # torch.full((1,), 0.5)

    # Check 1: small graph, single-tile path.
    N, E = 10, 8
    k1, k2, k3 = jax.random.split(key, 3)
    emb = jax.random.normal(k1, (N, H), dtype=jnp.float32)
    src = jax.random.randint(k2, (E,), 0, N, dtype=jnp.int32)
    dst = jax.random.randint(k3, (E,), 0, N, dtype=jnp.int32)
    out = jax.block_until_ready(local_emb_D_forward(emb, src, dst, d, scale))
    ref = _reference(emb, src, dst, d, scale)
    assert out.shape == (E, 1)
    assert jnp.allclose(out, ref, atol=1e-5, rtol=1e-5)

    # Check 2: forced small tile -> multi-step grid path.
    N2, E2 = 64, 300
    k4, k5, k6 = jax.random.split(jax.random.PRNGKey(1), 3)
    emb2 = jax.random.normal(k4, (N2, H), dtype=jnp.float32)
    src2 = jax.random.randint(k5, (E2,), 0, N2, dtype=jnp.int32)
    dst2 = jax.random.randint(k6, (E2,), 0, N2, dtype=jnp.int32)
    out2 = jax.block_until_ready(
        local_emb_D_forward(emb2, src2, dst2, d, scale, edge_tile=128))
    ref2 = _reference(emb2, src2, dst2, d, scale)
    assert out2.shape == (E2, 1)
    assert jnp.allclose(out2, ref2, atol=1e-5, rtol=1e-5)

    # Check 3: automatic tiling path (>= 2 parallel tiles for megacore).
    N3, E3 = 64, 3000
    k7, k8, k9 = jax.random.split(jax.random.PRNGKey(2), 3)
    emb3 = jax.random.normal(k7, (N3, H), dtype=jnp.float32)
    src3 = jax.random.randint(k8, (E3,), 0, N3, dtype=jnp.int32)
    dst3 = jax.random.randint(k9, (E3,), 0, N3, dtype=jnp.int32)
    out3 = jax.block_until_ready(local_emb_D_forward(emb3, src3, dst3, d, scale))
    ref3 = _reference(emb3, src3, dst3, d, scale)
    assert out3.shape == (E3, 1)
    assert jnp.allclose(out3, ref3, atol=1e-5, rtol=1e-5)

    print("KERNEL_OK")
</pallas_src>

<mosaic_0001>
module attributes {stable_mosaic.version = 11 : i64} {
  func.func @_edge_dot_kernel(%arg0: i32, %arg1: memref<32x128xf32, #tpu.memory_space<vmem>>, %arg2: memref<32x128xf32, #tpu.memory_space<vmem>>, %arg3: memref<32x1xf32, #tpu.memory_space<vmem>>, %arg4: memref<1x128xf32, #tpu.memory_space<vmem>>) attributes {dimension_semantics = [#tpu.dimension_semantics<parallel>], iteration_bounds = array<i64: 1>, scalar_prefetch = 0 : i64, scratch_operands = 0 : i64, tpu.core_type = #tpu.core_type<tc>, window_params = [{transform_indices = @transform_0, window_bounds = array<i64: 32, 128>}, {transform_indices = @transform_1, window_bounds = array<i64: 32, 128>}, {pipeline_mode = #tpu.pipeline_mode<synchronous>, transform_indices = @transform_2, window_bounds = array<i64: 32, 1>}, {transform_indices = @transform_3, window_bounds = array<i64: 1, 128>}]} {
    %c0 = arith.constant 0 : index
    %c0_0 = arith.constant 0 : index
    %0 = vector.load %arg1[%c0, %c0_0] : memref<32x128xf32, #tpu.memory_space<vmem>>, vector<32x128xf32>
    %c0_1 = arith.constant 0 : index
    %c0_2 = arith.constant 0 : index
    %1 = vector.load %arg2[%c0_1, %c0_2] : memref<32x128xf32, #tpu.memory_space<vmem>>, vector<32x128xf32>
    %c0_3 = arith.constant 0 : index
    %c0_4 = arith.constant 0 : index
    %2 = vector.load %arg3[%c0_3, %c0_4] : memref<32x1xf32, #tpu.memory_space<vmem>>, vector<32x1xf32>
    %3 = vector.broadcast %2 : vector<32x1xf32> to vector<32x128xf32>
    %4 = arith.mulf %0, %3 : vector<32x128xf32>
    %5 = arith.mulf %4, %1 : vector<32x128xf32>
    %cst = arith.constant dense<0.000000e+00> : vector<128xf32>
    %6 = vector.multi_reduction <add>, %5, %cst [0] : vector<32x128xf32> to vector<128xf32>
    %7 = vector.shape_cast %6 : vector<128xf32> to vector<1x128xf32>
    %8 = arith.mulf %0, %0 : vector<32x128xf32>
    %cst_5 = arith.constant dense<0.000000e+00> : vector<128xf32>
    %9 = vector.multi_reduction <add>, %8, %cst_5 [0] : vector<32x128xf32> to vector<128xf32>
    %10 = vector.shape_cast %9 : vector<128xf32> to vector<1x128xf32>
    %11 = arith.mulf %1, %1 : vector<32x128xf32>
    %cst_6 = arith.constant dense<0.000000e+00> : vector<128xf32>
    %12 = vector.multi_reduction <add>, %11, %cst_6 [0] : vector<32x128xf32> to vector<128xf32>
    %13 = vector.shape_cast %12 : vector<128xf32> to vector<1x128xf32>
    %cst_7 = arith.constant 1.000000e-24 : f32
    %14 = vector.broadcast %cst_7 : f32 to vector<1x128xf32>
    %15 = arith.maximumf %10, %14 : vector<1x128xf32>
    %cst_8 = arith.constant 1.000000e-24 : f32
    %16 = vector.broadcast %cst_8 : f32 to vector<1x128xf32>
    %17 = arith.maximumf %13, %16 : vector<1x128xf32>
    %18 = arith.mulf %15, %17 : vector<1x128xf32>
    %19 = math.rsqrt %18 : vector<1x128xf32>
    %20 = arith.mulf %7, %19 : vector<1x128xf32>
    %c0_9 = arith.constant 0 : index
    %c0_10 = arith.constant 0 : index
    %21 = vector.load %arg4[%c0_9, %c0_10] : memref<1x128xf32, #tpu.memory_space<vmem>>, vector<1x128xf32>
    tpu.vector_store %arg4[%c0_9, %c0_10], %20 {strides = array<i32>} : memref<1x128xf32, #tpu.memory_space<vmem>>, vector<1x128xf32>,
    return
  }
  func.func @transform_0(%arg0: i32) -> (i32, i32) {
    %c0_i32 = arith.constant 0 : i32
    %c0_i32_0 = arith.constant 0 : i32
    return %c0_i32, %arg0 : i32, i32
  }
  func.func @transform_1(%arg0: i32) -> (i32, i32) {
    %c0_i32 = arith.constant 0 : i32
    %c0_i32_0 = arith.constant 0 : i32
    return %c0_i32, %arg0 : i32, i32
  }
  func.func @transform_2(%arg0: i32) -> (i32, i32) {
    %c0_i32 = arith.constant 0 : i32
    %c0_i32_0 = arith.constant 0 : i32
    %c0_i32_1 = arith.constant 0 : i32
    return %c0_i32, %c0_i32_0 : i32, i32
  }
  func.func @transform_3(%arg0: i32) -> (i32, i32) {
    %c0_i32 = arith.constant 0 : i32
    %c0_i32_0 = arith.constant 0 : i32
    return %c0_i32, %arg0 : i32, i32
  }
}

</mosaic_0001>

<bundles_post_ra>
// kernel: local_emb_D_forward.1
= control target key start
LH: loop header
LB: loop body
LE: loop exit
PB: predicated region body
PF: predicated region fallthrough
CT: control target
= control target key end

     0   :  { %v104_v0 = vmov 0   ;;  %s164_s2 = inlined_call_operand.vmem [shape: f32[32,1], index: 2, kind: input, shape index: {}]   ;;  %s165_s0 = inlined_call_operand.vmem [shape: f32[32,128], index: 0, kind: input, shape index: {}]   ;;  %s166_s1 = inlined_call_operand.vmem [shape: f32[32,128], index: 1, kind: input, shape index: {}]   ;;  %s167_s3 = inlined_call_operand.vmem [shape: f32[1,128], index: 3, kind: output, shape index: {}]  }
   0x1   :  { %101 = vset.pattern.permute.xlu1 %v104_v0  ;;  %100 = vset.pattern.permute.xlu0 %v104_v0  ;;  %v24_v1 = vld [vmem:[%s164_s2 + $0x10] sm:$0xff]  ;;  %v22_v2 = vld [vmem:[%s164_s2] sm:$0xff]  ;;  %v25_v3 = vld [vmem:[%s164_s2 + $0x18] sm:$0xff] }
   0x2   :  { %38 = vperm.xlu1 %101, %v24_v1   ;;  %28 = vperm.xlu0 %100, %v22_v2   ;;  %v23_v4 = vld [vmem:[%s164_s2 + $0x8] sm:$0xff]  ;;  %v14_v5 = vld [vmem:[%s165_s0] sm:$0xff]  ;;  %v16_v13 = vld [vmem:[%s165_s0 + $0x10] sm:$0xff] }
   0x3   :  { %v18_v6 = vld [vmem:[%s166_s1] sm:$0xff]  ;;  %v15_v7 = vld [vmem:[%s165_s0 + $0x8] sm:$0xff]  ;;  %v63_v9 = vmul.f32 %v14_v5, %v14_v5  ;;  %v20_v14 = vld [vmem:[%s166_s1 + $0x10] sm:$0xff]  ;;  %v65_v15 = vmul.f32 %v16_v13, %v16_v13 }
   0x4   :  { %v19_v8 = vld [vmem:[%s166_s1 + $0x8] sm:$0xff]  ;;  %v76_v10 = vmul.f32 %v18_v6, %v18_v6  ;;  %v64_v11 = vmul.f32 %v15_v7, %v15_v7  ;;  %v78_v16 = vmul.f32 %v20_v14, %v20_v14  ;;  %v17_v19 = vld [vmem:[%s165_s0 + $0x18] sm:$0xff] }
   0x5   :  { %v77_v12 = vmul.f32 %v19_v8, %v19_v8  ;;  %v21_v20 = vld [vmem:[%s166_s1 + $0x18] sm:$0xff]  ;;  %v66_v21 = vmul.f32 %v17_v19, %v17_v19 }
   0x6   :  { %43 = vperm.xlu1 %101, %v25_v3   ;;  %33 = vperm.xlu0 %100, %v23_v4   ;;  %v67_v17 = vadd.f32 %v64_v11, %v63_v9  ;;  %v79_v22 = vmul.f32 %v21_v20, %v21_v20 }
   0x7   :  { %v80_v18 = vadd.f32 %v77_v12, %v76_v10 }
   0x8   :  { %v68_v23 = vadd.f32 %v67_v17, %v65_v15 }
   0x9   :  { %v81_v24 = vadd.f32 %v80_v18, %v78_v16 }
   0xa   :  { %v69_v25 = vadd.f32 %v68_v23, %v66_v21 }
   0xb   :  { %v82_v26 = vadd.f32 %v81_v24, %v79_v22 }
   0xc   :  { %v70_v27 = vrot.slane %v69_v25, 4 }
   0xd   :  { %v83_v28 = vrot.slane %v82_v26, 4 }
   0xe   :  { %v71_v29 = vadd.f32 %v70_v27, %v69_v25 }
   0xf   :  { %v84_v30 = vadd.f32 %v83_v28, %v82_v26 }
  0x10   :  { %v72_v31 = vrot.slane %v71_v29, 2 }
  0x11   :  { %v85_v32 = vrot.slane %v84_v30, 2 }
  0x12   :  { %v73_v33 = vadd.f32 %v72_v31, %v71_v29 }
  0x13   :  { %v86_v34 = vadd.f32 %v85_v32, %v84_v30 }
  0x14   :  { %v74_v35 = vrot.slane %v73_v33, 1 }
  0x15   :  { %v87_v36 = vrot.slane %v86_v34, 1 }
  0x16   :  { %v75_v39 = vadd.f32 %v74_v35, %v73_v33 }
  0x17   :  { %v88_v40 = vadd.f32 %v87_v36, %v86_v34 }
  0x18   :  { %v89_v46 = vmax.f32 %v75_v39, 1e-24 }
  0x19   :  { %v90_v47 = vmax.f32 %v88_v40, 1e-24 }
  0x1b   :  { %v91_v53 = vmul.f32 %v90_v47, %v89_v46 }
  0x1d   :  { %102 = vrsqrt.f32 %v91_v53 }
  0x27   :  { %v103_v62 = vpop.eup %102 }
  0x81   :  { %v39_v37 = vpop.permute.xlu1 %38  ;;  %v29_v38 = vpop.permute.xlu0 %28 }
  0x82   :  { %v46_v41 = vmul.f32 %v29_v38, %v14_v5  ;;  %v48_v44 = vmul.f32 %v39_v37, %v16_v13 }
  0x84   :  { %v50_v48 = vmul.f32 %v46_v41, %v18_v6  ;;  %v52_v51 = vmul.f32 %v48_v44, %v20_v14 }
  0x85   :  { %v44_v42 = vpop.permute.xlu1 %43  ;;  %v34_v43 = vpop.permute.xlu0 %33 }
  0x86   :  { %v47_v45 = vmul.f32 %v34_v43, %v15_v7  ;;  %v49_v49 = vmul.f32 %v44_v42, %v17_v19 }
  0x88   :  { %v51_v50 = vmul.f32 %v47_v45, %v19_v8  ;;  %v53_v54 = vmul.f32 %v49_v49, %v21_v20 }
  0x8a   :  { %v54_v52 = vadd.f32 %v51_v50, %v50_v48 }
  0x8c   :  { %v55_v55 = vadd.f32 %v54_v52, %v52_v51 }
  0x8e   :  { %v56_v56 = vadd.f32 %v55_v55, %v53_v54 }
  0x90   :  { %v57_v57 = vrot.slane %v56_v56, 4 }
  0x92   :  { %v58_v58 = vadd.f32 %v57_v57, %v56_v56 }
  0x94   :  { %v59_v59 = vrot.slane %v58_v58, 2 }
  0x96   :  { %v60_v60 = vadd.f32 %v59_v59, %v58_v58 }
  0x98   :  { %v61_v61 = vrot.slane %v60_v60, 1 }
  0x9a   :  { %v62_v63 = vadd.f32 %v61_v61, %v60_v60 }
  0x9c   :  { %v93_v0 = vmul.f32 %v103_v62, %v62_v63 }
  0x9e   :  { %94 = vst [vmem:[%s167_s3] sm:$0x1] %v93_v0 }

</bundles_post_ra>
